<compile_context>
chip_gen: v5e
topology: v5e:2x2
jax: 0.10.0
libtpu: 0.0.40
codegen_flags: <defaults>
</compile_context>

<pallas_src>
import functools

import jax
import jax.numpy as jnp
from jax.experimental import pallas as pl
from jax.experimental.pallas import tpu as pltpu


# ---------------------------------------------------------------------------
# Generation-aware compiler params
# ---------------------------------------------------------------------------

@functools.lru_cache(maxsize=None)
def _vmem_limit_bytes():
    # ~75% of physical VMEM, capped at 100 MiB:
    #   v5e/v6e (128 MiB physical) -> ~96 MiB,  v7x (64 MiB) -> 48 MiB.
    cap = 64 * 1024 * 1024          # conservative fallback (v7x-sized)
    try:
        info = pltpu.get_tpu_info()
        cap = int(getattr(info, "vmem_capacity_bytes", cap))
    except Exception:
        pass
    return min((cap * 3) // 4, 100 * 1024 * 1024)


_SINGLE_BUFFER_OK = None


def _probe_single_buffer():
    """Check once whether pipeline_mode=pl.Buffered(1) is supported."""
    try:
        def _copy(x_ref, o_ref):
            o_ref[...] = x_ref[...]

        f = pl.pallas_call(
            _copy,
            out_shape=jax.ShapeDtypeStruct((8, 128), jnp.float32),
            grid=(1,),
            in_specs=[pl.BlockSpec((8, 128), lambda i: (0, 0),
                                   pipeline_mode=pl.Buffered(buffer_count=1))],
            out_specs=pl.BlockSpec((8, 128), lambda i: (0, 0)),
        )
        jax.block_until_ready(f(jnp.zeros((8, 128), jnp.float32)))
        return True
    except Exception:
        return False


def _const_spec(shape):
    """BlockSpec for an operand whose block never changes across the grid.

    Requests single buffering (no point double-buffering a block that is
    never re-fetched); falls back to the default if unsupported."""
    global _SINGLE_BUFFER_OK
    if _SINGLE_BUFFER_OK is None:
        _SINGLE_BUFFER_OK = _probe_single_buffer()
    index_map = lambda i: tuple(0 for _ in shape)
    if _SINGLE_BUFFER_OK:
        return pl.BlockSpec(shape, index_map,
                            pipeline_mode=pl.Buffered(buffer_count=1))
    return pl.BlockSpec(shape, index_map)


# ---------------------------------------------------------------------------
# In-kernel building blocks
# ---------------------------------------------------------------------------

def _embed_tokens(x_ref, we_ref, be_ref, pos_ref, bt):
    """Patch-embed + bias + positional embedding for `bt` batch elements.

    x_ref: (bt, N, Pd) f32 block.  Returns (bt*N, D) bf16 tokens.
    The f32->bf16 cast of the patches happens here (no HBM bf16 copy)."""
    n, pd = x_ref.shape[1], x_ref.shape[2]
    x = x_ref[...].reshape(bt * n, pd).astype(jnp.bfloat16)
    tok = jnp.dot(x, we_ref[...], preferred_element_type=jnp.float32)
    # f32 elementwise adds (v5e has no bf16 VALU path).
    tok = tok.reshape(bt, n, -1) + be_ref[...][None] + pos_ref[...][None]
    return tok.reshape(bt * n, -1).astype(jnp.bfloat16)


def _token_mlp(x, w1_ref, b1_ref, w2_ref, b2_ref):
    """gelu(x @ W1 + b1) @ W2 + b2, bf16 operands with f32 MXU accumulation."""
    h = jnp.dot(x, w1_ref[...], preferred_element_type=jnp.float32)
    # NOTE: tanh-approx GELU (== torch.nn.GELU(approximate='tanh')); PyTorch's
    # default exact-erf GELU differs by a tiny numerical amount.
    h = jax.nn.gelu(h + b1_ref[...], approximate=True)
    y = jnp.dot(h.astype(jnp.bfloat16), w2_ref[...],
                preferred_element_type=jnp.float32)
    return (y + b2_ref[...]).astype(jnp.bfloat16)


# ---------------------------------------------------------------------------
# Fused kernels
# ---------------------------------------------------------------------------

def _fused_masked_kernel(x_ref, we_ref, be_ref, pos_ref, idx_ref,
                         w1_ref, b1_ref, w2_ref, b2_ref, o_ref, *, bt, g, k):
    """Embed `bt` batch elements, gather all G masks, run the token MLP."""
    n = x_ref.shape[1]
    tok = _embed_tokens(x_ref, we_ref, be_ref, pos_ref, bt)      # (bt*n, D)
    rows = bt * g * k
    # Vectorized gather on the MXU: one-hot [rows, bt*n] @ tok.  Each one-hot
    # row has exactly one 1.0, so the f32-accumulated matmul reproduces the
    # gathered bf16 row exactly.
    idx = idx_ref[...]                                           # (rows, 1) i32
    onehot = (idx == jax.lax.broadcasted_iota(jnp.int32, (rows, bt * n), 1)
              ).astype(jnp.bfloat16)
    xg = jnp.dot(onehot, tok,
                 preferred_element_type=jnp.float32).astype(jnp.bfloat16)
    o_ref[...] = _token_mlp(xg, w1_ref, b1_ref, w2_ref, b2_ref)  # (rows, D)


def _fused_full_kernel(x_ref, we_ref, be_ref, pos_ref,
                       w1_ref, b1_ref, w2_ref, b2_ref, o_ref, *, bt):
    """masks=None fast path: embed -> MLP, no gather at all."""
    tok = _embed_tokens(x_ref, we_ref, be_ref, pos_ref, bt)      # (bt*n, D)
    o_ref[...] = _token_mlp(tok, w1_ref, b1_ref, w2_ref, b2_ref)


# ---------------------------------------------------------------------------
# pallas_call wrappers
# ---------------------------------------------------------------------------

def multimask_fused_forward(params, patches, masks_stacked, *, batch_tile=None):
    """patches: [B, N, Pd] f32; masks_stacked: [G, B, K] int token indices.
    Returns [B, G, K, D] bf16 in ONE fused pallas_call for all masks."""
    B, N, Pd = patches.shape
    G, _, K = masks_stacked.shape
    D = params["w_embed"].shape[1]
    H = params["w1"].shape[1]
    # TODO(synk): at real scale choose bt so bt*G*K ~ 256 rows (v6e/v7x MXU)
    # and bt*N fills the embed matmul; here B is tiny so one step does it all.
    bt = B if batch_tile is None else batch_tile
    assert B % bt == 0
    n_tiles = B // bt
    rows_per_tile = bt * G * K

    # Flat within-tile gather indices, row-ordered (b, g, k):
    #   source row for output row (b, g, k) = (b % bt) * N + mask[g, b, k]
    local_b = (jnp.arange(B, dtype=jnp.int32) % bt) * N                 # [B]
    gidx = (jnp.transpose(masks_stacked, (1, 0, 2)).astype(jnp.int32)
            + local_b[:, None, None]).reshape(B * G * K, 1)             # i32

    kernel = functools.partial(_fused_masked_kernel, bt=bt, g=G, k=K)
    out = pl.pallas_call(
        kernel,
        out_shape=jax.ShapeDtypeStruct((B * G * K, D), jnp.bfloat16),
        grid=(n_tiles,),
        in_specs=[
            pl.BlockSpec((bt, N, Pd), lambda i: (i, 0, 0)),
            _const_spec((Pd, D)),          # w_embed
            _const_spec((1, D)),           # b_embed
            _const_spec((N, D)),           # pos_embed
            pl.BlockSpec((rows_per_tile, 1), lambda i: (i, 0)),
            _const_spec((D, H)),           # w1
            _const_spec((1, H)),           # b1
            _const_spec((H, D)),           # w2
            _const_spec((1, D)),           # b2
        ],
        out_specs=pl.BlockSpec((rows_per_tile, D), lambda i: (i, 0)),
        compiler_params=pltpu.CompilerParams(
            dimension_semantics=("parallel",),     # batch tiles -> both v7x TCs
            vmem_limit_bytes=_vmem_limit_bytes()),
    )(patches, params["w_embed"], params["b_embed"], params["pos_embed"],
      gidx, params["w1"], params["b1"], params["w2"], params["b2"])
    return out.reshape(B, G, K, D)


def full_fused_forward(params, patches, *, batch_tile=None):
    """masks=None path: [B, N, Pd] f32 -> [B, N, D] bf16, no gather."""
    B, N, Pd = patches.shape
    D = params["w_embed"].shape[1]
    H = params["w1"].shape[1]
    bt = B if batch_tile is None else batch_tile
    assert B % bt == 0
    kernel = functools.partial(_fused_full_kernel, bt=bt)
    out = pl.pallas_call(
        kernel,
        out_shape=jax.ShapeDtypeStruct((B * N, D), jnp.bfloat16),
        grid=(B // bt,),
        in_specs=[
            pl.BlockSpec((bt, N, Pd), lambda i: (i, 0, 0)),
            _const_spec((Pd, D)),
            _const_spec((1, D)),
            _const_spec((N, D)),
            _const_spec((D, H)),
            _const_spec((1, H)),
            _const_spec((H, D)),
            _const_spec((1, D)),
        ],
        out_specs=pl.BlockSpec((bt * N, D), lambda i: (i, 0)),
        compiler_params=pltpu.CompilerParams(
            dimension_semantics=("parallel",),
            vmem_limit_bytes=_vmem_limit_bytes()),
    )(patches, params["w_embed"], params["b_embed"], params["pos_embed"],
      params["w1"], params["b1"], params["w2"], params["b2"])
    return out.reshape(B, N, D)


# ---------------------------------------------------------------------------
# Synthetic backbone + MultiMaskWrapper forward
# ---------------------------------------------------------------------------

def _patchify(x, patch):
    # x: [B, C, H, W] (NCHW, PyTorch convention) -> [B, N, C*p*p] (XLA glue).
    # TODO(synk): the transpose/reshape stays in XLA; a strided/Element
    # index_map reading NCHW directly would remove this materialization too.
    B, C, H, W = x.shape
    gh, gw = H // patch, W // patch
    x = x.reshape(B, C, gh, patch, gw, patch)
    x = jnp.transpose(x, (0, 2, 4, 1, 3, 5))           # [B, gh, gw, C, p, p]
    return x.reshape(B, gh * gw, C * patch * patch)    # stays f32; cast in-kernel


class SyntheticViTBackbone:
    """Patch-embed (+pos) -> token MLP, fully fused per forward path."""

    def __init__(self, params, patch):
        self.params = params
        self.patch = patch

    def patchify(self, x):
        return _patchify(x, self.patch)

    def __call__(self, x, masks=None):
        patches = self.patchify(x)
        if masks is None:
            return full_fused_forward(self.params, patches)       # [B, N, D]
        out = multimask_fused_forward(self.params, patches,
                                      masks.astype(jnp.int32)[None])
        return out[:, 0]                                           # [B, K, D]


def multi_mask_wrapper_forward(backbone, x, masks=None):
    """MultiMaskWrapper.forward semantics.  Mask-independent work (patchify)
    is hoisted out of the per-mask loop and equal-shape masks are batched
    into a single fused embed+gather+MLP pallas_call; per-mask outputs are
    still returned as a list."""
    if masks is None:
        return backbone(x)
    if not isinstance(masks, list):
        masks = [masks]
    patches = backbone.patchify(x)                       # computed ONCE
    if all(m.shape == masks[0].shape for m in masks):
        stacked = jnp.stack([m.astype(jnp.int32) for m in masks], axis=0)
        out = multimask_fused_forward(backbone.params, patches, stacked)
        return [out[:, g] for g in range(len(masks))]
    # Ragged masks (different K): one fused call per mask, reusing patches.
    return [multimask_fused_forward(backbone.params, patches,
                                    m.astype(jnp.int32)[None])[:, 0]
            for m in masks]


# ---------------------------------------------------------------------------
# Pure-JAX reference (same dtype flow) for correctness checking
# ---------------------------------------------------------------------------

def reference_forward(params, patch, x, masks=None):
    patches = _patchify(x, patch).astype(jnp.bfloat16)
    tok = jnp.einsum("bnp,pd->bnd", patches, params["w_embed"],
                     preferred_element_type=jnp.float32)
    tok = (tok + params["b_embed"][None] + params["pos_embed"][None]
           ).astype(jnp.bfloat16)

    def mlp(t):
        h = jnp.einsum("bkd,dh->bkh", t, params["w1"],
                       preferred_element_type=jnp.float32)
        h = jax.nn.gelu(h + params["b1"][None], approximate=True)
        y = jnp.einsum("bkh,hd->bkd", h.astype(jnp.bfloat16), params["w2"],
                       preferred_element_type=jnp.float32)
        return (y + params["b2"][None]).astype(jnp.bfloat16)

    if masks is None:
        return mlp(tok)
    if not isinstance(masks, list):
        masks = [masks]
    outs = []
    for m in masks:
        g = jnp.take_along_axis(tok, m.astype(jnp.int32)[:, :, None], axis=1)
        outs.append(mlp(g))
    return outs


def _allclose(a, b, tol=2e-2):
    return bool(jnp.allclose(a.astype(jnp.float32), b.astype(jnp.float32),
                             atol=tol, rtol=tol))


# ---------------------------------------------------------------------------
# Main
# ---------------------------------------------------------------------------

if __name__ == "__main__":
    key = jax.random.PRNGKey(0)
    B, C, H, W = 2, 4, 16, 16
    patch = 4
    N = (H // patch) * (W // patch)      # 16 tokens
    Pd = C * patch * patch               # 64
    D = 128                              # embed dim   (lane-dense: 1 x 128)
    Hmlp = 256                           # mlp hidden  (lane-dense: 2 x 128)
    K = 8                                # tokens kept per mask

    ks = jax.random.split(key, 10)
    params = {
        "w_embed":   (jax.random.normal(ks[0], (Pd, D), jnp.float32) * 0.02
                      ).astype(jnp.bfloat16),
        "b_embed":   jax.random.normal(ks[7], (1, D), jnp.float32) * 0.02,
        "pos_embed": jax.random.normal(ks[1], (N, D), jnp.float32) * 0.02,
        "w1":        (jax.random.normal(ks[2], (D, Hmlp), jnp.float32) * 0.02
                      ).astype(jnp.bfloat16),
        "b1":        jax.random.normal(ks[8], (1, Hmlp), jnp.float32) * 0.02,
        "w2":        (jax.random.normal(ks[3], (Hmlp, D), jnp.float32) * 0.02
                      ).astype(jnp.bfloat16),
        "b2":        jax.random.normal(ks[9], (1, D), jnp.float32) * 0.02,
    }
    backbone = SyntheticViTBackbone(params, patch)

    x = jax.random.normal(ks[4], (B, C, H, W), jnp.float32)

    # two masks, each keeping K token indices per sample
    mask_a = jax.random.permutation(ks[5], N)[:K]
    mask_b = jax.random.permutation(ks[6], N)[:K]
    masks = [jnp.tile(mask_a[None, :], (B, 1)).astype(jnp.int32),
             jnp.tile(mask_b[None, :], (B, 1)).astype(jnp.int32)]

    # path 1: no masks -> single output [B, N, D] (no-gather fast path)
    out_full = multi_mask_wrapper_forward(backbone, x, masks=None)
    jax.block_until_ready(out_full)
    assert out_full.shape == (B, N, D)
    assert _allclose(out_full, reference_forward(params, patch, x, None))

    # path 2: list of masks -> list of outputs [B, K, D] (one fused call)
    outs = multi_mask_wrapper_forward(backbone, x, masks=masks)
    jax.block_until_ready(outs)
    refs = reference_forward(params, patch, x, masks)
    assert isinstance(outs, list) and len(outs) == len(masks)
    assert all(o.shape == (B, K, D) for o in outs)
    assert all(_allclose(o, r) for o, r in zip(outs, refs))

    # path 3: single (non-list) mask -> list of length 1
    outs_single = multi_mask_wrapper_forward(backbone, x, masks=masks[0])
    jax.block_until_ready(outs_single)
    assert isinstance(outs_single, list) and len(outs_single) == 1
    assert outs_single[0].shape == (B, K, D)
    assert _allclose(outs_single[0], refs[0])

    print("KERNEL_OK")
</pallas_src>

<mosaic_0001>
module attributes {stable_mosaic.version = 11 : i64} {
  func.func @_copy(%arg0: i32, %arg1: memref<8x128xf32, #tpu.memory_space<vmem>>, %arg2: memref<8x128xf32, #tpu.memory_space<vmem>>) attributes {dimension_semantics = [#tpu.dimension_semantics<arbitrary>], iteration_bounds = array<i64: 1>, scalar_prefetch = 0 : i64, scratch_operands = 0 : i64, tpu.core_type = #tpu.core_type<tc>, window_params = [{pipeline_mode = #tpu.pipeline_mode<synchronous>, transform_indices = @transform_0, window_bounds = array<i64: 8, 128>}, {pipeline_mode = #tpu.pipeline_mode<synchronous>, transform_indices = @transform_1, window_bounds = array<i64: 8, 128>}]} {
    %c0 = arith.constant 0 : index
    %c0_0 = arith.constant 0 : index
    %0 = vector.load %arg1[%c0, %c0_0] : memref<8x128xf32, #tpu.memory_space<vmem>>, vector<8x128xf32>
    %c0_1 = arith.constant 0 : index
    %c0_2 = arith.constant 0 : index
    %1 = vector.load %arg2[%c0_1, %c0_2] : memref<8x128xf32, #tpu.memory_space<vmem>>, vector<8x128xf32>
    tpu.vector_store %arg2[%c0_1, %c0_2], %0 {strides = array<i32>} : memref<8x128xf32, #tpu.memory_space<vmem>>, vector<8x128xf32>,
    return
  }
  func.func @transform_0(%arg0: i32) -> (i32, i32) {
    %c0_i32 = arith.constant 0 : i32
    %c0_i32_0 = arith.constant 0 : i32
    %c0_i32_1 = arith.constant 0 : i32
    return %c0_i32, %c0_i32_0 : i32, i32
  }
  func.func @transform_1(%arg0: i32) -> (i32, i32) {
    %c0_i32 = arith.constant 0 : i32
    %c0_i32_0 = arith.constant 0 : i32
    %c0_i32_1 = arith.constant 0 : i32
    return %c0_i32, %c0_i32_0 : i32, i32
  }
}

module attributes {stable_mosaic.version = 11 : i64} {
  func.func @_fused_full_kernel(%arg0: i32, %arg1: memref<2x16x64xf32, #tpu.memory_space<vmem>>, %arg2: memref<64x128xbf16, #tpu.memory_space<vmem>>, %arg3: memref<1x128xf32, #tpu.memory_space<vmem>>, %arg4: memref<16x128xf32, #tpu.memory_space<vmem>>, %arg5: memref<128x256xbf16, #tpu.memory_space<vmem>>, %arg6: memref<1x256xf32, #tpu.memory_space<vmem>>, %arg7: memref<256x128xbf16, #tpu.memory_space<vmem>>, %arg8: memref<1x128xf32, #tpu.memory_space<vmem>>, %arg9: memref<32x128xbf16, #tpu.memory_space<vmem>>) attributes {dimension_semantics = [#tpu.dimension_semantics<parallel>], iteration_bounds = array<i64: 1>, scalar_prefetch = 0 : i64, scratch_operands = 0 : i64, tpu.core_type = #tpu.core_type<tc>, window_params = [{transform_indices = @transform_0, window_bounds = array<i64: 2, 16, 64>}, {pipeline_mode = #tpu.pipeline_mode<synchronous>, transform_indices = @transform_1, window_bounds = array<i64: 64, 128>}, {pipeline_mode = #tpu.pipeline_mode<synchronous>, transform_indices = @transform_2, window_bounds = array<i64: 1, 128>}, {pipeline_mode = #tpu.pipeline_mode<synchronous>, transform_indices = @transform_3, window_bounds = array<i64: 16, 128>}, {pipeline_mode = #tpu.pipeline_mode<synchronous>, transform_indices = @transform_4, window_bounds = array<i64: 128, 256>}, {pipeline_mode = #tpu.pipeline_mode<synchronous>, transform_indices = @transform_5, window_bounds = array<i64: 1, 256>}, {pipeline_mode = #tpu.pipeline_mode<synchronous>, transform_indices = @transform_6, window_bounds = array<i64: 256, 128>}, {pipeline_mode = #tpu.pipeline_mode<synchronous>, transform_indices = @transform_7, window_bounds = array<i64: 1, 128>}, {transform_indices = @transform_8, window_bounds = array<i64: 32, 128>}]} {
    %c0 = arith.constant 0 : index
    %c0_0 = arith.constant 0 : index
    %c0_1 = arith.constant 0 : index
    %0 = vector.load %arg1[%c0, %c0_0, %c0_1] : memref<2x16x64xf32, #tpu.memory_space<vmem>>, vector<2x16x64xf32>
    %1 = vector.shape_cast %0 : vector<2x16x64xf32> to vector<32x64xf32>
    %2 = arith.truncf %1 : vector<32x64xf32> to vector<32x64xbf16>
    %c0_2 = arith.constant 0 : index
    %c0_3 = arith.constant 0 : index
    %3 = vector.load %arg2[%c0_2, %c0_3] : memref<64x128xbf16, #tpu.memory_space<vmem>>, vector<64x128xbf16>
    %cst = arith.constant dense<0.000000e+00> : vector<32x128xf32>
    %4 = tpu.matmul %2, %3, %cst {dimension_numbers = #tpu.dot_dimension_numbers<[1], [0], [0], [1], [0, 0, 1, 1], [], []>} : vector<32x64xbf16>, vector<64x128xbf16>, vector<32x128xf32> -> vector<32x128xf32>
    %5 = vector.shape_cast %4 : vector<32x128xf32> to vector<2x16x128xf32>
    %c0_4 = arith.constant 0 : index
    %c0_5 = arith.constant 0 : index
    %6 = vector.load %arg3[%c0_4, %c0_5] : memref<1x128xf32, #tpu.memory_space<vmem>>, vector<1x128xf32>
    %7 = vector.shape_cast %6 : vector<1x128xf32> to vector<1x1x128xf32>
    %8 = vector.broadcast %7 : vector<1x1x128xf32> to vector<2x16x128xf32>
    %9 = arith.addf %5, %8 : vector<2x16x128xf32>
    %c0_6 = arith.constant 0 : index
    %c0_7 = arith.constant 0 : index
    %10 = vector.load %arg4[%c0_6, %c0_7] : memref<16x128xf32, #tpu.memory_space<vmem>>, vector<16x128xf32>
    %11 = vector.shape_cast %10 : vector<16x128xf32> to vector<1x16x128xf32>
    %12 = vector.broadcast %11 : vector<1x16x128xf32> to vector<2x16x128xf32>
    %13 = arith.addf %9, %12 : vector<2x16x128xf32>
    %14 = vector.shape_cast %13 : vector<2x16x128xf32> to vector<32x128xf32>
    %15 = arith.truncf %14 : vector<32x128xf32> to vector<32x128xbf16>
    %c0_8 = arith.constant 0 : index
    %c0_9 = arith.constant 0 : index
    %16 = vector.load %arg5[%c0_8, %c0_9] : memref<128x256xbf16, #tpu.memory_space<vmem>>, vector<128x256xbf16>
    %cst_10 = arith.constant dense<0.000000e+00> : vector<32x256xf32>
    %17 = tpu.matmul %15, %16, %cst_10 {dimension_numbers = #tpu.dot_dimension_numbers<[1], [0], [0], [1], [0, 0, 1, 1], [], []>} : vector<32x128xbf16>, vector<128x256xbf16>, vector<32x256xf32> -> vector<32x256xf32>
    %c0_11 = arith.constant 0 : index
    %c0_12 = arith.constant 0 : index
    %18 = vector.load %arg6[%c0_11, %c0_12] : memref<1x256xf32, #tpu.memory_space<vmem>>, vector<1x256xf32>
    %19 = vector.broadcast %18 : vector<1x256xf32> to vector<32x256xf32>
    %20 = arith.addf %17, %19 : vector<32x256xf32>
    %21 = arith.mulf %20, %20 : vector<32x256xf32>
    %22 = arith.mulf %20, %21 : vector<32x256xf32>
    %cst_13 = arith.constant 4.471500e-02 : f32
    %23 = vector.broadcast %cst_13 : f32 to vector<32x256xf32>
    %24 = arith.mulf %23, %22 : vector<32x256xf32>
    %25 = arith.addf %20, %24 : vector<32x256xf32>
    %cst_14 = arith.constant 0.797884583 : f32
    %26 = vector.broadcast %cst_14 : f32 to vector<32x256xf32>
    %27 = arith.mulf %26, %25 : vector<32x256xf32>
    %28 = math.tanh %27 : vector<32x256xf32>
    %cst_15 = arith.constant 1.000000e+00 : f32
    %29 = vector.broadcast %cst_15 : f32 to vector<32x256xf32>
    %30 = arith.addf %29, %28 : vector<32x256xf32>
    %cst_16 = arith.constant 5.000000e-01 : f32
    %31 = vector.broadcast %cst_16 : f32 to vector<32x256xf32>
    %32 = arith.mulf %31, %30 : vector<32x256xf32>
    %33 = arith.mulf %20, %32 : vector<32x256xf32>
    %34 = arith.truncf %33 : vector<32x256xf32> to vector<32x256xbf16>
    %c0_17 = arith.constant 0 : index
    %c0_18 = arith.constant 0 : index
    %35 = vector.load %arg7[%c0_17, %c0_18] : memref<256x128xbf16, #tpu.memory_space<vmem>>, vector<256x128xbf16>
    %cst_19 = arith.constant dense<0.000000e+00> : vector<32x128xf32>
    %36 = tpu.matmul %34, %35, %cst_19 {dimension_numbers = #tpu.dot_dimension_numbers<[1], [0], [0], [1], [0, 0, 1, 1], [], []>} : vector<32x256xbf16>, vector<256x128xbf16>, vector<32x128xf32> -> vector<32x128xf32>
    %c0_20 = arith.constant 0 : index
    %c0_21 = arith.constant 0 : index
    %37 = vector.load %arg8[%c0_20, %c0_21] : memref<1x128xf32, #tpu.memory_space<vmem>>, vector<1x128xf32>
    %38 = vector.broadcast %37 : vector<1x128xf32> to vector<32x128xf32>
    %39 = arith.addf %36, %38 : vector<32x128xf32>
    %40 = arith.truncf %39 : vector<32x128xf32> to vector<32x128xbf16>
    %c0_22 = arith.constant 0 : index
    %c0_23 = arith.constant 0 : index
    %41 = vector.load %arg9[%c0_22, %c0_23] : memref<32x128xbf16, #tpu.memory_space<vmem>>, vector<32x128xbf16>
    tpu.vector_store %arg9[%c0_22, %c0_23], %40 {strides = array<i32>} : memref<32x128xbf16, #tpu.memory_space<vmem>>, vector<32x128xbf16>,
    return
  }
  func.func @transform_0(%arg0: i32) -> (i32, i32, i32) {
    %c0_i32 = arith.constant 0 : i32
    %c0_i32_0 = arith.constant 0 : i32
    %c0_i32_1 = arith.constant 0 : i32
    return %arg0, %c0_i32, %c0_i32_0 : i32, i32, i32
  }
  func.func @transform_1(%arg0: i32) -> (i32, i32) {
    %c0_i32 = arith.constant 0 : i32
    %c0_i32_0 = arith.constant 0 : i32
    %c0_i32_1 = arith.constant 0 : i32
    return %c0_i32, %c0_i32_0 : i32, i32
  }
  func.func @transform_2(%arg0: i32) -> (i32, i32) {
    %c0_i32 = arith.constant 0 : i32
    %c0_i32_0 = arith.constant 0 : i32
    %c0_i32_1 = arith.constant 0 : i32
    return %c0_i32, %c0_i32_0 : i32, i32
  }
  func.func @transform_3(%arg0: i32) -> (i32, i32) {
    %c0_i32 = arith.constant 0 : i32
    %c0_i32_0 = arith.constant 0 : i32
    %c0_i32_1 = arith.constant 0 : i32
    return %c0_i32, %c0_i32_0 : i32, i32
  }
  func.func @transform_4(%arg0: i32) -> (i32, i32) {
    %c0_i32 = arith.constant 0 : i32
    %c0_i32_0 = arith.constant 0 : i32
    %c0_i32_1 = arith.constant 0 : i32
    return %c0_i32, %c0_i32_0 : i32, i32
  }
  func.func @transform_5(%arg0: i32) -> (i32, i32) {
    %c0_i32 = arith.constant 0 : i32
    %c0_i32_0 = arith.constant 0 : i32
    %c0_i32_1 = arith.constant 0 : i32
    return %c0_i32, %c0_i32_0 : i32, i32
  }
  func.func @transform_6(%arg0: i32) -> (i32, i32) {
    %c0_i32 = arith.constant 0 : i32
    %c0_i32_0 = arith.constant 0 : i32
    %c0_i32_1 = arith.constant 0 : i32
    return %c0_i32, %c0_i32_0 : i32, i32
  }
  func.func @transform_7(%arg0: i32) -> (i32, i32) {
    %c0_i32 = arith.constant 0 : i32
    %c0_i32_0 = arith.constant 0 : i32
    %c0_i32_1 = arith.constant 0 : i32
    return %c0_i32, %c0_i32_0 : i32, i32
  }
  func.func @transform_8(%arg0: i32) -> (i32, i32) {
    %c0_i32 = arith.constant 0 : i32
    %c0_i32_0 = arith.constant 0 : i32
    return %arg0, %c0_i32 : i32, i32
  }
}

</mosaic_0001>

<bundles_post_ra>
// kernel: tpu_custom_call.1
= control target key start
LH: loop header
LB: loop body
LE: loop exit
PB: predicated region body
PF: predicated region fallthrough
CT: control target
= control target key end

     0   :  { %6 = vsyncpa [#allocation3], 0  ;;  %s114_s0 = inlined_call_operand.hbm [shape: f32[8,128], index: 0, kind: input, shape index: {}]   ;;  %s115_s1 = inlined_call_operand.hbm [shape: f32[8,128], index: 1, kind: output, shape index: {}]  }
   0x1   :  { %7 = vsyncpa [#allocation4], 0  ;;  %s13_s8 = sshll.u32 %s114_s0, 4  ;;  %s96_s9 = smov [#allocation2]   ;;  %s14_s8 = int_to_ptr.hbm [resolvable:$true] %s13_s8 }
   0x2   :  { %s15_s10 = sshll.u32 %s96_s9, 4  ;;  %s16_s10 = int_to_ptr.vmem [resolvable:$true] %s15_s10 }
   0x3   :  { %18 = dma.hbm_to_vmem [thread:$0]  %s14_s8, 128, %s16_s10, [#allocation3]  }
   0x4   :  { %92 = dma.done.wait [#allocation3], 128  }
   0x5   :  { %93 = vsyncadd [#allocation3], 4294967168  ;;  %s97_s11 = smov [#allocation5]   ;;  %s32_s15 = sshll.u32 %s115_s1, 4  ;;  %v23_v0 = vld [vmem:[#allocation2] sm:$0xff]  ;;  %s33_s15 = int_to_ptr.hbm [resolvable:$true] %s32_s15 }
   0x6   :  { %s30_s12 = sshll.u32 %s97_s11, 4  ;;  %24 = vst [vmem:[#allocation5] sm:$0xff] %v23_v0  ;;  %s31_s12 = int_to_ptr.vmem [resolvable:$true] %s30_s12 }
   0x7   :  { %35 = dma.vmem_to_hbm [thread:$0]  %s31_s12, 128, %s33_s15, [#allocation4]  }
   0x8   :  { %94 = dma.done.wait [#allocation4], 128  }
   0x9   :  { %95 = vsyncadd [#allocation4], 4294967168 }
   0xa   :  { %40 = vsyncpa [#allocation3], 1 }
   0xb   :  { %41 = vsyncpa [#allocation4], 1 }

// kernel: tpu_custom_call.1
= control target key start
LH: loop header
LB: loop body
LE: loop exit
PB: predicated region body
PF: predicated region fallthrough
CT: control target
= control target key end

     0   :  { %13 = vsyncpa [#allocation3], 0  ;;  %s1096_s0 = inlined_call_operand.hbm [shape: f32[2,16,64], index: 0, kind: input, shape index: {}]   ;;  %s1097_s1 = inlined_call_operand.hbm [shape: bf16[64,128], index: 1, kind: input, shape index: {}]   ;;  %s1098_s2 = inlined_call_operand.vmem [shape: f32[1,128], index: 2, kind: input, shape index: {}]   ;;  %s1099_s3 = inlined_call_operand.hbm [shape: f32[16,128], index: 3, kind: input, shape index: {}]   ;;  %s1100_s4 = inlined_call_operand.hbm [shape: bf16[128,256], index: 4, kind: input, shape index: {}]   ;;  %s1101_s5 = inlined_call_operand.vmem [shape: f32[1,256], index: 5, kind: input, shape index: {}]   ;;  %s1102_s6 = inlined_call_operand.hbm [shape: bf16[256,128], index: 6, kind: input, shape index: {}]   ;;  %s1103_s7 = inlined_call_operand.vmem [shape: f32[1,128], index: 7, kind: input, shape index: {}]   ;;  %s1104_s8 = inlined_call_operand.hbm [shape: bf16[32,128], index: 8, kind: output, shape index: {}]  }
   0x1   :  { %14 = vsyncpa [#allocation6], 0 }
   0x2   :  { %15 = vsyncpa [#allocation9], 0  ;;  %s34_s29 = sshll.u32 %s1097_s1, 4  ;;  %s35_s29 = int_to_ptr.hbm [resolvable:$true] %s34_s29 }
   0x3   :  { %16 = vsyncpa [#allocation4], 0  ;;  %s977_s30 = smov [#allocation5]   ;;  %s978_s10 = smov 64  }
   0x4   :  { %s36_s9 = sshll.u32 %s977_s30, 4  ;;  %s979_s11 = smov 4   ;;  %s37_s9 = int_to_ptr.vmem [resolvable:$true] %s36_s9 }
   0x5   :  { %42 = dma.hbm_to_vmem [thread:$0]  %s35_s29, 512, %s37_s9, [#allocation6], %s978_s10, %s978_s10, %s979_s11  }
   0x6   :  { %s62_s14 = sshll.u32 %s1100_s4, 4  ;;  %s980_s15 = smov [#allocation8]   ;;  %s63_s14 = int_to_ptr.hbm [resolvable:$true] %s62_s14 }
   0x7   :  { %s64_s16 = sshll.u32 %s980_s15, 4  ;;  %s21_s18 = sshll.u32 %s1096_s0, 4  ;;  %s65_s16 = int_to_ptr.vmem [resolvable:$true] %s64_s16  ;;  %s22_s18 = int_to_ptr.hbm [resolvable:$true] %s21_s18 }
   0x8   :  { %s981_s19 = smov 128   ;;  %s982_s20 = smov 8  }
   0x9   :  { %70 = dma.hbm_to_vmem [thread:$0]  %s63_s14, 2048, %s65_s16, [#allocation9], %s981_s19, %s981_s19, %s982_s20  }
   0xa   :  { %s49_s23 = sshll.u32 %s1099_s3, 4  ;;  %s983_s24 = smov [#allocation2]   ;;  %s50_s23 = int_to_ptr.hbm [resolvable:$true] %s49_s23 }
   0xb   :  { %s23_s25 = sshll.u32 %s983_s24, 4  ;;  %s984_s4 = smov [#allocation7]   ;;  %s24_s25 = int_to_ptr.vmem [resolvable:$true] %s23_s25 }
   0xc   :  { %29 = dma.hbm_to_vmem [thread:$0]  %s22_s18, 512, %s24_s25, [#allocation3], %s981_s19, %s981_s19, %s982_s20  }
   0xd   :  { %s51_s26 = sshll.u32 %s984_s4, 4  ;;  %s77_s0 = sshll.u32 %s1102_s6, 4  ;;  %s52_s26 = int_to_ptr.vmem [resolvable:$true] %s51_s26  ;;  %s78_s0 = int_to_ptr.hbm [resolvable:$true] %s77_s0 }
   0xe   :  { %57 = dma.hbm_to_vmem [thread:$0]  %s50_s23, 256, %s52_s26, [#allocation6], %s981_s19, %s981_s19, %s982_s20  }
   0xf   :  { %s985_s29 = smov [#allocation10]  }
  0x10   :  { %s79_s30 = sshll.u32 %s985_s29, 4  ;;  %s80_s30 = int_to_ptr.vmem [resolvable:$true] %s79_s30 }
  0x11   :  { %85 = dma.hbm_to_vmem [thread:$0]  %s78_s0, 2048, %s80_s30, [#allocation9], %s978_s10, %s978_s10, %s979_s11  }
  0x12   :  { %969 = dma.done.wait [#allocation3], 512  }
  0x13   :  { %970 = vsyncadd [#allocation3], 4294966784 }
  0x14   :  { %971 = dma.done.wait [#allocation6], 768  }
  0x15   :  { %972 = vsyncadd [#allocation6], 4294966528 }
  0x16   :  { %973 = dma.done.wait [#allocation9], 4096  }
  0x17   :  { %974 = vsyncadd [#allocation9], 4294963200  ;;  %v753_v0 = vld [vmem:[#allocation5 + $0x18] sm:$0xff]  ;;  %v752_v1 = vld [vmem:[#allocation5 + $0x10] sm:$0xff]  ;;  %vm147_vm0 = vcmask 523264   ;;  %s986_s13 = smov [#allocation11]  }
  0x18   :  { %158 = vmatpush.bf16.msra.mxu0 %v753_v0  ;;  %v680_v2 = vld [vmem:[#allocation8 + $0x70] sm:$0xf]  ;;  %v769_v3 = vld [vmem:[#allocation8 + $0x74] sm:$0xf0]  ;;  %v768_v4 = vld [vmem:[#allocation8 + $0x74] sm:$0xf] }
  0x19   :  { %v682_v5 = vld [vmem:[#allocation8 + $0x78] sm:$0xf0]  ;;  %v681_v6 = vor.u32 %v769_v3, %v680_v2  ;;  %v672_v8 = vld [vmem:[#allocation8 + $0x60] sm:$0xf]  ;;  %v767_v9 = vld [vmem:[#allocation8 + $0x64] sm:$0xf0] }
  0x1a   :  { %v685_v7 = vor.u32 %v768_v4, %v682_v5  ;;  %v766_v10 = vld [vmem:[#allocation8 + $0x64] sm:$0xf]  ;;  %v674_v11 = vld [vmem:[#allocation8 + $0x68] sm:$0xf0]  ;;  %v751_v12 = vld [vmem:[#allocation5 + $0x8] sm:$0xff]  ;;  %v673_v13 = vor.u32 %v767_v9, %v672_v8  ;;  %s587_s14 = sshll.u32 %s986_s13, 4  ;;  %s588_s14 = int_to_ptr.vmem [resolvable:$true] %s587_s14 }
  0x1b   :  { %291 = vmatpush.bf16.msra.mxu1 %v681_v6  ;;  %v677_v14 = vor.u32 %v766_v10, %v674_v11  ;;  %v664_v15 = vld [vmem:[#allocation8 + $0x50] sm:$0xf]  ;;  %v765_v16 = vld [vmem:[#allocation8 + $0x54] sm:$0xf0]  ;;  %v764_v17 = vld [vmem:[#allocation8 + $0x54] sm:$0xf] }
  0x1c   :  { %159 = vmatpush.bf16.msra.mxu0 %v752_v1  ;;  %310 = vmatpush.bf16.msra.mxu2 %v685_v7  ;;  %v666_v18 = vld [vmem:[#allocation8 + $0x58] sm:$0xf0]  ;;  %v750_v19 = vld [vmem:[#allocation5] sm:$0xff]  ;;  %v665_v22 = vor.u32 %v765_v16, %v664_v15  ;;  %v656_v24 = vld [vmem:[#allocation8 + $0x40] sm:$0xf] }
  0x1d   :  { %v109_v20 = vld [vmem:[#allocation2] sm:$0xff]  ;;  %v110_v21 = vld [vmem:[#allocation2 + $0x8] sm:$0xff]  ;;  %v669_v23 = vor.u32 %v764_v17, %v666_v18  ;;  %v763_v25 = vld [vmem:[#allocation8 + $0x44] sm:$0xf0] }
  0x1e   :  { %v762_v26 = vld [vmem:[#allocation8 + $0x44] sm:$0xf]  ;;  %v658_v27 = vld [vmem:[#allocation8 + $0x48] sm:$0xf0]  ;;  %v113_v28 = vpack.c.bf16 %v110_v21, %v109_v20  ;;  %v657_v29 = vor.u32 %v763_v25, %v656_v24  ;;  %v648_v34 = vld [vmem:[#allocation8 + $0x30] sm:$0xf] }
  0x1f   :  { %292 = vmatpush.bf16.msra.mxu1 %v673_v13  ;;  %v661_v30 = vor.u32 %v762_v26, %v658_v27  ;;  %v111_v31 = vld [vmem:[#allocation2 + $0x10] sm:$0xff]  ;;  %v112_v32 = vld [vmem:[#allocation2 + $0x18] sm:$0xff]  ;;  %v761_v35 = vld [vmem:[#allocation8 + $0x34] sm:$0xf0] }
  0x20   :  { %160 = vmatpush.bf16.msra.mxu0 %v751_v12  ;;  %311 = vmatpush.bf16.msra.mxu2 %v677_v14  ;;  %v114_v33 = vpack.c.bf16 %v112_v32, %v111_v31  ;;  %v760_v36 = vld [vmem:[#allocation8 + $0x34] sm:$0xf]  ;;  %v649_v37 = vor.u32 %v761_v35, %v648_v34  ;;  %v650_v38 = vld [vmem:[#allocation8 + $0x38] sm:$0xf0]  ;;  %v640_v40 = vld [vmem:[#allocation8 + $0x20] sm:$0xf] }
  0x21   :  { %v653_v39 = vor.u32 %v760_v36, %v650_v38  ;;  %v759_v41 = vld [vmem:[#allocation8 + $0x24] sm:$0xf0]  ;;  %v758_v43 = vld [vmem:[#allocation8 + $0x24] sm:$0xf]  ;;  %v642_v44 = vld [vmem:[#allocation8 + $0x28] sm:$0xf0] }
  0x22   :  { %v641_v42 = vor.u32 %v759_v41, %v640_v40  ;;  %v645_v45 = vor.u32 %v758_v43, %v642_v44  ;;  %v632_v46 = vld [vmem:[#allocation8 + $0x10] sm:$0xf]  ;;  %v757_v47 = vld [vmem:[#allocation8 + $0x14] sm:$0xf0]  ;;  %v756_v48 = vld [vmem:[#allocation8 + $0x14] sm:$0xf] }
  0x23   :  { %293 = vmatpush.bf16.msra.mxu1 %v665_v22  ;;  %v633_v49 = vor.u32 %v757_v47, %v632_v46  ;;  %v634_v50 = vld [vmem:[#allocation8 + $0x18] sm:$0xf0]  ;;  %v624_v52 = vld [vmem:[#allocation8] sm:$0xf]  ;;  %v755_v53 = vld [vmem:[#allocation8 + $0x4] sm:$0xf0] }
  0x24   :  { %161 = vmatpush.bf16.msra.mxu0 %v750_v19  ;;  %312 = vmatpush.bf16.msra.mxu2 %v669_v23  ;;  %v637_v51 = vor.u32 %v756_v48, %v634_v50  ;;  %v625_v54 = vor.u32 %v755_v53, %v624_v52  ;;  %v754_v55 = vld [vmem:[#allocation8 + $0x4] sm:$0xf]  ;;  %v626_v56 = vld [vmem:[#allocation8 + $0x8] sm:$0xf0]  ;;  %v807_v59 = vld [vmem:[%s1098_s2] ss:$0 sm:$0xff] }
  0x25   :  { %v629_v57 = vor.u32 %v754_v55, %v626_v56  ;;  %v181_v61 = vld [vmem:[#allocation7] sm:$0xff]  ;;  %v182_v63 = vld [vmem:[#allocation7 + $0x8] sm:$0xff]  ;;  %v775_v14 = vld [vmem:[#allocation10 + $0x28] sm:$0xff] }
  0x26   :  { %v777_v11 = vld [vmem:[#allocation10 + $0x38] sm:$0xff]  ;;  %v776_v12 = vld [vmem:[#allocation10 + $0x30] sm:$0xff]  ;;  %v774_v16 = vld [vmem:[#allocation10 + $0x20] sm:$0xff] }
  0x27   :  { %620 = vmatmul.msk.bf16.vlgmr.msra.gmra.mxu0 %vm147_vm0, %v113_v28  ;;  %294 = vmatpush.bf16.msra.mxu1 %v657_v29  ;;  %v785_v13 = vld [vmem:[#allocation10 + $0x78] sm:$0xff]  ;;  %v784_v15 = vld [vmem:[#allocation10 + $0x70] sm:$0xff]  ;;  %v783_v17 = vld [vmem:[#allocation10 + $0x68] sm:$0xff] }
  0x28   :  { %313 = vmatpush.bf16.msra.mxu2 %v661_v30  ;;  %537 = vmatpush.bf16.msra.mxu3 %v777_v11  ;;  %v773_v18 = vld [vmem:[#allocation10 + $0x18] sm:$0xff]  ;;  %v782_v19 = vld [vmem:[#allocation10 + $0x60] sm:$0xff]  ;;  %v772_v20 = vld [vmem:[#allocation10 + $0x10] sm:$0xff] }
  0x29   :  { %556 = vmatpush.bf16.msrb.mxu0 %v785_v13  ;;  %v781_v21 = vld [vmem:[#allocation10 + $0x58] sm:$0xff]  ;;  %v205_v22 = vld [vmem:[%s1101_s5] sm:$0x3]  ;;  %v771_v23 = vld [vmem:[#allocation10 + $0x8] sm:$0xff] }
  0x2a   :  { %v207_v24 = vperm.slane %v205_v22, 0  ;;  %v780_v25 = vld [vmem:[#allocation10 + $0x50] sm:$0xff]  ;;  %v770_v26 = vld [vmem:[#allocation10] sm:$0xff]  ;;  %v779_v29 = vld [vmem:[#allocation10 + $0x48] sm:$0xff]  ;;  %v208_v31 = vperm.slane %v205_v22, 1 }
  0x2b   :  { %295 = vmatpush.bf16.msra.mxu1 %v649_v37 }
  0x2c   :  { %314 = vmatpush.bf16.msra.mxu2 %v653_v39  ;;  %538 = vmatpush.bf16.msra.mxu3 %v776_v12 }
  0x2d   :  { %557 = vmatpush.bf16.msrb.mxu0 %v784_v15 }
  0x2f   :  { %296 = vmatpush.bf16.msra.mxu1 %v641_v42 }
  0x30   :  { %315 = vmatpush.bf16.msra.mxu2 %v645_v45  ;;  %539 = vmatpush.bf16.msra.mxu3 %v775_v14 }
  0x31   :  { %558 = vmatpush.bf16.msrb.mxu0 %v783_v17 }
  0x33   :  { %297 = vmatpush.bf16.msra.mxu1 %v633_v49 }
  0x34   :  { %316 = vmatpush.bf16.msra.mxu2 %v637_v51  ;;  %540 = vmatpush.bf16.msra.mxu3 %v774_v16 }
  0x35   :  { %559 = vmatpush.bf16.msrb.mxu0 %v782_v19 }
  0x37   :  { %621 = vmatmul.msk.bf16.gmra.mxu0 %vm147_vm0, %v114_v33  ;;  %298 = vmatpush.bf16.msra.mxu1 %v625_v54  ;;  %v778_v33 = vld [vmem:[#allocation10 + $0x40] sm:$0xff] }
  0x38   :  { %317 = vmatpush.bf16.msra.mxu2 %v629_v57  ;;  %541 = vmatpush.bf16.msra.mxu3 %v773_v18 }
  0x39   :  { %560 = vmatpush.bf16.msrb.mxu0 %v781_v21 }
  0x3c   :  { %542 = vmatpush.bf16.msra.mxu3 %v772_v20 }
  0x3d   :  { %561 = vmatpush.bf16.msrb.mxu0 %v780_v25 }
  0x40   :  { %543 = vmatpush.bf16.msra.mxu3 %v771_v23 }
  0x41   :  { %562 = vmatpush.bf16.msrb.mxu0 %v779_v29 }
  0x44   :  { %544 = vmatpush.bf16.msra.mxu3 %v770_v26 }
  0x45   :  { %563 = vmatpush.bf16.msrb.mxu0 %v778_v33 }
  0xa4   :  { %v163_v58 = vpop.f32.mrf.mxu0 }
  0xa5   :  { %v177_v60 = vadd.f32 %v807_v59, %v163_v58 }
  0xa7   :  { %v183_v1 = vadd.f32 %v181_v61, %v177_v60 }
  0xac   :  { %v165_v62 = vpop.f32.mrf.mxu0 }
  0xad   :  { %v178_v0 = vadd.f32 %v807_v59, %v165_v62 }
  0xaf   :  { %v184_v2 = vadd.f32 %v182_v63, %v178_v0 }
  0xb1   :  { %v187_v3 = vpack.c.bf16 %v184_v2, %v183_v1 }
  0xb3   :  { %299 = vmatmul.bf16.vlgmr.msra.gmra.mxu1 %v187_v3  ;;  %318 = vmatmul.bf16.vlgmr.msra.gmra.mxu2 %v187_v3 }
  0xb4   :  { %v168_v4 = vpop.f32.mrf.mxu0 }
  0xb5   :  { %v179_v5 = vadd.f32 %v807_v59, %v168_v4 }
  0xb7   :  { %v185_v8 = vadd.f32 %v181_v61, %v179_v5 }
  0xbc   :  { %v170_v6 = vpop.f32.mrf.mxu0 }
  0xbd   :  { %v180_v7 = vadd.f32 %v807_v59, %v170_v6 }
  0xbf   :  { %v186_v9 = vadd.f32 %v182_v63, %v180_v7 }
  0xc1   :  { %v188_v10 = vpack.c.bf16 %v186_v9, %v185_v8 }
  0xc3   :  { %304 = vmatmul.bf16.gmra.mxu1 %v188_v10  ;;  %323 = vmatmul.bf16.gmra.mxu2 %v188_v10 }
 0x130   :  { %v300_v27 = vpop.f32.mrf.mxu1 }
 0x131   :  { %v1059_v28 = vadd.f32 %v300_v27, %v207_v24 }
 0x133   :  { %v329_v30 = vmul.f32 %v1059_v28, %v1059_v28 }
 0x135   :  { %v337_v32 = vmul.f32 %v329_v30, %v1059_v28 }
 0x136   :  { %v319_v34 = vpop.f32.mrf.mxu2 }
 0x137   :  { %v345_v35 = vmul.f32 0.044715, %v337_v32  ;;  %v1064_v36 = vadd.f32 %v319_v34, %v208_v31 }
 0x138   :  { %v302_v37 = vpop.f32.mrf.mxu1 }
 0x139   :  { %v353_v38 = vadd.f32 %v345_v35, %v1059_v28  ;;  %v330_v39 = vmul.f32 %v1064_v36, %v1064_v36  ;;  %v303_v40 = vadd.f32 %v302_v37, %v207_v24 }
 0x13b   :  { %v338_v41 = vmul.f32 %v330_v39, %v1064_v36  ;;  %v331_v42 = vmul.f32 %v303_v40, %v303_v40  ;;  %v361_v43 = vmul.f32 0.7978846, %v353_v38 }
 0x13d   :  { %v346_v44 = vmul.f32 0.044715, %v338_v41  ;;  %v339_v45 = vmul.f32 %v331_v42, %v303_v40  ;;  %809 = vtanh.f32 %v361_v43 }
 0x13e   :  { %v321_v46 = vpop.f32.mrf.mxu2 }
 0x13f   :  { %v354_v47 = vadd.f32 %v346_v44, %v1064_v36  ;;  %v347_v48 = vmul.f32 0.044715, %v339_v45  ;;  %v322_v49 = vadd.f32 %v321_v46, %v208_v31 }
 0x140   :  { %v305_v50 = vpop.f32.mrf.mxu1 }
 0x141   :  { %v362_v51 = vmul.f32 0.7978846, %v354_v47  ;;  %v355_v52 = vadd.f32 %v347_v48, %v303_v40  ;;  %v332_v53 = vmul.f32 %v322_v49, %v322_v49  ;;  %v1071_v54 = vadd.f32 %v305_v50, %v207_v24 }
 0x143   :  { %v340_v55 = vmul.f32 %v332_v53, %v322_v49  ;;  %v333_v56 = vmul.f32 %v1071_v54, %v1071_v54  ;;  %v363_v57 = vmul.f32 0.7978846, %v355_v52  ;;  %811 = vtanh.f32 %v362_v51  ;;  %v810_v58 = vpop.eup %809 }
 0x144   :  { %v377_v2 = vadd.f32 1.0, %v810_v58 }
 0x145   :  { %v348_v59 = vmul.f32 0.044715, %v340_v55  ;;  %v341_v60 = vmul.f32 %v333_v56, %v1071_v54  ;;  %813 = vtanh.f32 %v363_v57 }
 0x146   :  { %v324_v61 = vpop.f32.mrf.mxu2  ;;  %v385_v13 = vmul.f32 0.5, %v377_v2 }
 0x147   :  { %v356_v62 = vadd.f32 %v348_v59, %v322_v49  ;;  %v349_v63 = vmul.f32 0.044715, %v341_v60  ;;  %v1076_v0 = vadd.f32 %v324_v61, %v208_v31  ;;  %v808_v61 = vld [vmem:[%s1103_s7] ss:$0 sm:$0xff]  ;;  %s589_s7 = sshll.u32 %s1104_s8, 4  ;;  %s590_s7 = int_to_ptr.hbm [resolvable:$true] %s589_s7 }
 0x148   :  { %v307_v1 = vpop.f32.mrf.mxu1  ;;  %v393_v22 = vmul.f32 %v385_v13, %v1059_v28 }
 0x149   :  { %v364_v3 = vmul.f32 0.7978846, %v356_v62  ;;  %v357_v4 = vadd.f32 %v349_v63, %v1071_v54  ;;  %v334_v5 = vmul.f32 %v1076_v0, %v1076_v0  ;;  %v308_v6 = vadd.f32 %v307_v1, %v207_v24  ;;  %v812_v7 = vpop.eup %811 }
 0x14a   :  { %v378_v18 = vadd.f32 1.0, %v812_v7 }
 0x14b   :  { %v814_v8 = vpop.eup %813  ;;  %815 = vtanh.f32 %v364_v3  ;;  %v342_v9 = vmul.f32 %v334_v5, %v1076_v0  ;;  %v335_v10 = vmul.f32 %v308_v6, %v308_v6  ;;  %v365_v11 = vmul.f32 0.7978846, %v357_v4 }
 0x14c   :  { %v379_v12 = vadd.f32 1.0, %v814_v8  ;;  %v386_v32 = vmul.f32 0.5, %v378_v18 }
 0x14d   :  { %v350_v14 = vmul.f32 0.044715, %v342_v9  ;;  %v343_v15 = vmul.f32 %v335_v10, %v308_v6  ;;  %817 = vtanh.f32 %v365_v11 }
 0x14e   :  { %v326_v16 = vpop.f32.mrf.mxu2  ;;  %v387_v17 = vmul.f32 0.5, %v379_v12 }
 0x14f   :  { %v358_v19 = vadd.f32 %v350_v14, %v1076_v0  ;;  %v351_v20 = vmul.f32 0.044715, %v343_v15  ;;  %v327_v21 = vadd.f32 %v326_v16, %v208_v31  ;;  %v394_v31 = vmul.f32 %v386_v32, %v1064_v36 }
 0x150   :  { %v395_v23 = vmul.f32 %v387_v17, %v303_v40 }
 0x151   :  { %v816_v24 = vpop.eup %815  ;;  %v359_v25 = vadd.f32 %v351_v20, %v308_v6  ;;  %v336_v26 = vmul.f32 %v327_v21, %v327_v21  ;;  %v366_v27 = vmul.f32 0.7978846, %v358_v19 }
 0x152   :  { %v401_v29 = vpack.c.bf16 %v395_v23, %v393_v22  ;;  %v380_v30 = vadd.f32 1.0, %v816_v24 }
 0x153   :  { %v344_v33 = vmul.f32 %v336_v26, %v327_v21  ;;  %v367_v34 = vmul.f32 0.7978846, %v359_v25  ;;  %819 = vtanh.f32 %v366_v27  ;;  %v818_v37 = vpop.eup %817 }
 0x154   :  { %545 = vmatmul.bf16.vlgmr.msra.gmra.mxu3 %v401_v29  ;;  %v388_v35 = vmul.f32 0.5, %v380_v30  ;;  %v381_v41 = vadd.f32 1.0, %v818_v37 }
 0x155   :  { %v352_v38 = vmul.f32 0.044715, %v344_v33  ;;  %821 = vtanh.f32 %v367_v34 }
 0x156   :  { %v396_v39 = vmul.f32 %v388_v35, %v322_v49  ;;  %v389_v46 = vmul.f32 0.5, %v381_v41 }
 0x157   :  { %v360_v28 = vadd.f32 %v352_v38, %v327_v21 }
 0x158   :  { %v402_v40 = vpack.c.bf16 %v396_v39, %v394_v31  ;;  %v397_v50 = vmul.f32 %v389_v46, %v1071_v54 }
 0x159   :  { %v368_v42 = vmul.f32 0.7978846, %v360_v28  ;;  %v820_v43 = vpop.eup %819 }
 0x15a   :  { %564 = vmatmul.bf16.vlgmr.msrb.gmra.mxu0 %v402_v40  ;;  %v382_v48 = vadd.f32 1.0, %v820_v43 }
 0x15b   :  { %v822_v44 = vpop.eup %821  ;;  %823 = vtanh.f32 %v368_v42 }
 0x15c   :  { %v383_v45 = vadd.f32 1.0, %v822_v44  ;;  %v390_v36 = vmul.f32 0.5, %v382_v48 }
 0x15e   :  { %v391_v47 = vmul.f32 0.5, %v383_v45  ;;  %v398_v56 = vmul.f32 %v390_v36, %v1076_v0 }
 0x160   :  { %v399_v51 = vmul.f32 %v391_v47, %v308_v6 }
 0x161   :  { %v824_v52 = vpop.eup %823 }
 0x162   :  { %v403_v53 = vpack.c.bf16 %v399_v51, %v397_v50  ;;  %v384_v55 = vadd.f32 1.0, %v824_v52 }
 0x164   :  { %550 = vmatmul.bf16.gmra.mxu3 %v403_v53  ;;  %v392_v49 = vmul.f32 0.5, %v384_v55 }
 0x166   :  { %v400_v57 = vmul.f32 %v392_v49, %v327_v21 }
 0x168   :  { %v404_v58 = vpack.c.bf16 %v400_v57, %v398_v56 }
 0x16a   :  { %569 = vmatmul.bf16.gmra.mxu0 %v404_v58 }
 0x1d7   :  { %v546_v59 = vpop.f32.mrf.mxu3  ;;  %v565_v60 = vpop.f32.mrf.mxu0 }
 0x1d8   :  { %v547_v62 = vadd.f32 %v808_v61, %v546_v59 }
 0x1da   :  { %v566_v2 = vadd.f32 %v565_v60, %v547_v62 }
 0x1df   :  { %v548_v54 = vpop.f32.mrf.mxu3  ;;  %v567_v63 = vpop.f32.mrf.mxu0 }
 0x1e0   :  { %v549_v1 = vadd.f32 %v808_v61, %v548_v54 }
 0x1e2   :  { %v568_v3 = vadd.f32 %v567_v63, %v549_v1 }
 0x1e4   :  { %v789_v4 = vpack.c.bf16 %v568_v3, %v566_v2 }
 0x1e6   :  { %790 = vst [vmem:[#allocation11] sm:$0xff] %v789_v4  }
 0x1e7   :  { %v551_v5 = vpop.f32.mrf.mxu3  ;;  %v570_v6 = vpop.f32.mrf.mxu0 }
 0x1e8   :  { %v552_v0 = vadd.f32 %v808_v61, %v551_v5 }
 0x1ea   :  { %v571_v10 = vadd.f32 %v570_v6, %v552_v0 }
 0x1ef   :  { %v553_v7 = vpop.f32.mrf.mxu3  ;;  %v572_v9 = vpop.f32.mrf.mxu0 }
 0x1f0   :  { %v554_v8 = vadd.f32 %v808_v61, %v553_v7 }
 0x1f2   :  { %v573_v11 = vadd.f32 %v572_v9, %v554_v8 }
 0x1f4   :  { %v794_v12 = vpack.c.bf16 %v573_v11, %v571_v10 }
 0x1f6   :  { %796 = vst [vmem:[#allocation11 + $0x8] sm:$0xff] %v794_v12  }
 0x1f7   :  { %595 = dma.vmem_to_hbm [thread:$0]  %s588_s14, 256, %s590_s7, [#allocation4], %s978_s10, %s978_s10, %s979_s11  }
 0x1f8   :  { %975 = dma.done.wait [#allocation4], 256  }
 0x1f9   :  { %976 = vsyncadd [#allocation4], 4294967040 }
 0x1fa   :  { %600 = vsyncpa [#allocation3], 1 }
 0x1fb   :  { %601 = vsyncpa [#allocation6], 1 }
 0x1fc   :  { %602 = vsyncpa [#allocation9], 1 }
 0x1fd   :  { %603 = vsyncpa [#allocation4], 1 }

</bundles_post_ra>
